<compile_context>
chip_gen: v5e
topology: v5e:2x2
jax: 0.10.0
libtpu: 0.0.40
codegen_flags: <defaults>
</compile_context>

<pallas_src>
import functools

import numpy as np
import jax
import jax.numpy as jnp
from jax.experimental import pallas as pl
from jax.experimental.pallas import tpu as pltpu

EPS = 1e-8


# ---------------------------------------------------------------------------
# Kernel
# ---------------------------------------------------------------------------
def _ei_shunt_kernel(ne, ni, x_ref, xw_ref, eiw_ref, gb_ref, out_ref):
    """One grid step over a batch tile.

    x_ref  : (TB, n_input)                    activations tile
    xw_ref : (n_input, 2*ne + 2*ni)           fused x-side weights (resident)
    eiw_ref: (ni, 2*ne)                       block-diag [Wei.T ; Uei.T] (resident)
    gb_ref : (2, 2*ne)  row0=[W_g|U_g], row1=[bias|0]
    out_ref: (TB, ne)
    """
    ne2 = 2 * ne

    # Single fused matmul for every x-driven projection.
    fx = jnp.dot(x_ref[...], xw_ref[...], preferred_element_type=jnp.float32)
    ze = fx[:, :ne2]                       # [W_ze | U_ze]            (TB, 2*ne)
    zi = fx[:, ne2:ne2 + ni]               # [W_zi | U_zi]            (TB, ni)
    zis = fx[:, ne2 + ni:ne2 + 2 * ni]     # [W_zi*e^Wa | U_zi*e^Ua]  (TB, ni)

    # Subtractive + divisive inhibition share the same block-diagonal RHS.
    eiw = eiw_ref[...]                                                  # (ni, 2*ne)
    sub = jnp.dot(zi, eiw, preferred_element_type=jnp.float32)          # (TB, 2*ne)
    gamma = jnp.dot(zis, eiw, preferred_element_type=jnp.float32) + EPS

    g = gb_ref[0:1, :]                     # [W_g | U_g]   (1, 2*ne)
    bias = gb_ref[1:2, :ne]                # (1, ne)

    zhat = ze - sub                                                     # (TB, 2*ne)
    zwu = (g * zhat) * pl.reciprocal(gamma, approx=False)               # (TB, 2*ne)

    # nonlinearity=None -> identity
    out_ref[...] = (zwu[:, :ne] + zwu[:, ne2 - ne:] + bias).astype(out_ref.dtype)


# ---------------------------------------------------------------------------
# Parameter packing (do once per weight update, NOT per timestep)
# ---------------------------------------------------------------------------
def pack_ei_shunt_params(p, weight_dtype=jnp.float32):
    ne = p["Wex"].shape[0]
    n_input = p["Uex"].shape[1]
    ni_h2h = p["Wix"].shape[0]
    ni_i2h = p["Uix"].shape[0]
    # Module quirk: Wex/Wix are applied to x, so n_input must equal ne.
    assert p["Wex"].shape[1] == n_input, "module requires n_input == ne"

    w_ea = jnp.exp(p["W_alpha"])           # (1, ni_h2h)  hoisted out of the kernel
    u_ea = jnp.exp(p["U_alpha"])           # (1, ni_i2h)

    # Fused x-side weight, columns: [W_ze | U_ze | W_zi | U_zi | W_zi*ea | U_zi*ea]
    xw = jnp.concatenate(
        [p["Wex"].T, p["Uex"].T,
         p["Wix"].T, p["Uix"].T,
         p["Wix"].T * w_ea, p["Uix"].T * u_ea],
        axis=1).astype(weight_dtype)                       # (n_input, 2*ne + 2*ni)

    # Block-diagonal inhibitory weight shared by the zhat and gamma matmuls.
    ni = ni_h2h + ni_i2h
    eiw = jnp.zeros((ni, 2 * ne), jnp.float32)
    eiw = eiw.at[:ni_h2h, :ne].set(p["Wei"].T)
    eiw = eiw.at[ni_h2h:, ne:].set(p["Uei"].T)
    eiw = eiw.astype(weight_dtype)

    # Small per-output params packed into a single operand.
    gb = jnp.concatenate(
        [jnp.concatenate([p["W_g"].T, p["U_g"].T], axis=1),                # (1, 2*ne)
         jnp.concatenate([p["bias"].T, jnp.zeros((1, ne), jnp.float32)], axis=1)],
        axis=0).astype(jnp.float32)                                        # (2, 2*ne)

    return dict(xw=xw, eiw=eiw, gb=gb, ne=ne, ni=ni, n_input=n_input)


# ---------------------------------------------------------------------------
# Wrappers
# ---------------------------------------------------------------------------
def ei_rnn_cell_with_shunt(x, packed, *, block_b=256):
    """x: (B, n_input) float32. Returns (B, ne) float32."""
    B, n_input = x.shape
    ne, ni = packed["ne"], packed["ni"]
    assert n_input == packed["n_input"]
    xw, eiw, gb = packed["xw"], packed["eiw"], packed["gb"]

    tb = min(block_b, B)
    grid = (pl.cdiv(B, tb),)
    kernel = functools.partial(_ei_shunt_kernel, ne, ni)

    return pl.pallas_call(
        kernel,
        out_shape=jax.ShapeDtypeStruct((B, ne), jnp.float32),
        grid_spec=pltpu.PrefetchScalarGridSpec(
            num_scalar_prefetch=0,
            grid=grid,
            in_specs=[
                pl.BlockSpec((tb, n_input), lambda i: (i, 0)),   # streamed batch tile
                pl.BlockSpec(xw.shape, lambda i: (0, 0)),        # weights resident
                pl.BlockSpec(eiw.shape, lambda i: (0, 0)),       # weights resident
                pl.BlockSpec(gb.shape, lambda i: (0, 0)),        # small params resident
            ],
            out_specs=pl.BlockSpec((tb, ne), lambda i: (i, 0)),
        ),
        compiler_params=pltpu.CompilerParams(
            dimension_semantics=("parallel",),       # megacore-shardable on v7x
            vmem_limit_bytes=32 * 1024 * 1024,
        ),
    )(x, xw, eiw, gb)


def ei_rnn_cell_with_shunt_seq(xs, packed, *, block_b=256):
    """xs: (T, B, n_input). The module applies W to x (not the carried hidden
    state), so timesteps are independent: flatten T into the batch grid so the
    whole sequence is ONE pallas_call with weights resident across grid steps."""
    T, B, n_input = xs.shape
    out = ei_rnn_cell_with_shunt(xs.reshape(T * B, n_input), packed, block_b=block_b)
    return out.reshape(T, B, -1)


# ---------------------------------------------------------------------------
# Init + pure-JAX reference (torch semantics)
# ---------------------------------------------------------------------------
def init_params(key, n_input, ne, ni_i2h, ni_h2h, numerator=1.0 / 3.0):
    """Deterministic replica of EiRNNCell.init_weights (lognormal branch) +
    the extra shunt parameters from EiRNNCellWithShunt.__init__."""
    def calc_ln_mu_sigma(mean, var):
        mu = np.log(mean ** 2 / np.sqrt(mean ** 2 + var))
        sigma = np.sqrt(np.log(1.0 + var / mean ** 2))
        return mu, sigma

    k = jax.random.split(key, 4)

    t_w = np.sqrt(numerator * ne / (ne * (ne - 1)))
    mu_w, sig_w = calc_ln_mu_sigma(t_w, t_w ** 2)
    Wex = jnp.exp(mu_w + sig_w * jax.random.normal(k[0], (ne, ne)))
    Wei = jnp.exp(mu_w + sig_w * jax.random.normal(k[1], (ne, ni_h2h)))
    Wei = Wei / Wei.sum(axis=1, keepdims=True)
    Wix = jnp.ones((ni_h2h, 1)) * Wex.mean(axis=0, keepdims=True)

    t_u = np.sqrt(numerator * ne / (n_input * (ne - 1)))
    mu_u, sig_u = calc_ln_mu_sigma(t_u, t_u ** 2)
    Uex = jnp.exp(mu_u + sig_u * jax.random.normal(k[2], (ne, n_input)))
    Uei = jnp.exp(mu_u + sig_u * jax.random.normal(k[3], (ne, ni_i2h)))
    Uei = Uei / Uei.sum(axis=1, keepdims=True)
    Uix = jnp.ones((ni_i2h, 1)) * Uex.mean(axis=0, keepdims=True)

    f32 = lambda a: jnp.asarray(a, jnp.float32)
    return dict(
        Wex=f32(Wex), Wix=f32(Wix), Wei=f32(Wei),
        Uex=f32(Uex), Uix=f32(Uix), Uei=f32(Uei),
        bias=jnp.zeros((ne, 1), jnp.float32),          # exponentiated=False branch
        U_alpha=jnp.ones((1, ni_i2h), jnp.float32),
        W_alpha=jnp.ones((1, ni_h2h), jnp.float32),
        U_g=jnp.ones((ne, 1), jnp.float32),
        W_g=jnp.ones((ne, 1), jnp.float32),
    )


def reference_forward(x, p):
    """Pure-JAX transcription of EiRNNCellWithShunt.forward (torch semantics)."""
    xT = x.T                                                # (n_input, B)
    W_ze = p["Wex"] @ xT
    W_zi = p["Wix"] @ xT
    W_zhat = W_ze - p["Wei"] @ W_zi
    W_gamma = (jnp.exp(p["W_alpha"]) * p["Wei"]) @ W_zi + EPS
    W_z = p["W_g"] * ((1.0 / W_gamma) * W_zhat)
    U_ze = p["Uex"] @ xT
    U_zi = p["Uix"] @ xT
    U_zhat = U_ze - p["Uei"] @ U_zi
    U_gamma = (jnp.exp(p["U_alpha"]) * p["Uei"]) @ U_zi + EPS
    U_z = p["U_g"] * ((1.0 / U_gamma) * U_zhat)
    z = U_z + W_z + p["bias"]
    return z.T                                              # (B, ne)


if __name__ == "__main__":
    B = 8
    ne = 32
    n_input = 32        # must equal ne (module's forward applies Wex/Wix to x)
    ni_i2h = 4
    ni_h2h = 4

    key = jax.random.PRNGKey(0)
    kx, kp, ks = jax.random.split(key, 3)
    params = init_params(kp, n_input, ne, ni_i2h, ni_h2h)
    packed = pack_ei_shunt_params(params)   # once per weight update

    # Single-step call.
    x = jax.random.normal(kx, (B, n_input), dtype=jnp.float32)
    out = jax.block_until_ready(ei_rnn_cell_with_shunt(x, packed))
    ref = reference_forward(x, params)
    assert out.shape == (B, ne)
    np.testing.assert_allclose(np.asarray(out), np.asarray(ref), rtol=1e-5, atol=1e-5)

    # Sequence call: one pallas_call for all timesteps, weights resident across
    # the grid (block_b=8 -> 4 grid steps here).
    T = 4
    xs = jax.random.normal(ks, (T, B, n_input), dtype=jnp.float32)
    outs = jax.block_until_ready(ei_rnn_cell_with_shunt_seq(xs, packed, block_b=8))
    refs = jnp.stack([reference_forward(xs[t], params) for t in range(T)])
    np.testing.assert_allclose(np.asarray(outs), np.asarray(refs), rtol=1e-5, atol=1e-5)

    print("KERNEL_OK")
</pallas_src>

<mosaic_0001>
module attributes {stable_mosaic.version = 11 : i64} {
  func.func @_ei_shunt_kernel(%arg0: i32, %arg1: memref<8x32xf32, #tpu.memory_space<vmem>>, %arg2: memref<32x80xf32, #tpu.memory_space<vmem>>, %arg3: memref<8x64xf32, #tpu.memory_space<vmem>>, %arg4: memref<2x64xf32, #tpu.memory_space<vmem>>, %arg5: memref<8x32xf32, #tpu.memory_space<vmem>>) attributes {dimension_semantics = [#tpu.dimension_semantics<parallel>], iteration_bounds = array<i64: 1>, scalar_prefetch = 0 : i64, scratch_operands = 0 : i64, tpu.core_type = #tpu.core_type<tc>, window_params = [{transform_indices = @transform_0, window_bounds = array<i64: 8, 32>}, {pipeline_mode = #tpu.pipeline_mode<synchronous>, transform_indices = @transform_1, window_bounds = array<i64: 32, 80>}, {pipeline_mode = #tpu.pipeline_mode<synchronous>, transform_indices = @transform_2, window_bounds = array<i64: 8, 64>}, {pipeline_mode = #tpu.pipeline_mode<synchronous>, transform_indices = @transform_3, window_bounds = array<i64: 2, 64>}, {transform_indices = @transform_4, window_bounds = array<i64: 8, 32>}]} {
    %c0 = arith.constant 0 : index
    %c0_0 = arith.constant 0 : index
    %0 = vector.load %arg1[%c0, %c0_0] : memref<8x32xf32, #tpu.memory_space<vmem>>, vector<8x32xf32>
    %c0_1 = arith.constant 0 : index
    %c0_2 = arith.constant 0 : index
    %1 = vector.load %arg2[%c0_1, %c0_2] : memref<32x80xf32, #tpu.memory_space<vmem>>, vector<32x80xf32>
    %cst = arith.constant dense<0.000000e+00> : vector<8x80xf32>
    %2 = tpu.matmul %0, %1, %cst {dimension_numbers = #tpu.dot_dimension_numbers<[1], [0], [0], [1], [0, 0, 1, 1], [], []>} : vector<8x32xf32>, vector<32x80xf32>, vector<8x80xf32> -> vector<8x80xf32>
    %3 = vector.extract_strided_slice %2 {offsets = [0, 0], sizes = [8, 64], strides = [1, 1]} : vector<8x80xf32> to vector<8x64xf32>
    %4 = vector.extract_strided_slice %2 {offsets = [0, 64], sizes = [8, 8], strides = [1, 1]} : vector<8x80xf32> to vector<8x8xf32>
    %5 = vector.extract_strided_slice %2 {offsets = [0, 72], sizes = [8, 8], strides = [1, 1]} : vector<8x80xf32> to vector<8x8xf32>
    %c0_3 = arith.constant 0 : index
    %c0_4 = arith.constant 0 : index
    %6 = vector.load %arg3[%c0_3, %c0_4] : memref<8x64xf32, #tpu.memory_space<vmem>>, vector<8x64xf32>
    %cst_5 = arith.constant dense<0.000000e+00> : vector<8x64xf32>
    %7 = tpu.matmul %4, %6, %cst_5 {dimension_numbers = #tpu.dot_dimension_numbers<[1], [0], [0], [1], [0, 0, 1, 1], [], []>} : vector<8x8xf32>, vector<8x64xf32>, vector<8x64xf32> -> vector<8x64xf32>
    %cst_6 = arith.constant dense<0.000000e+00> : vector<8x64xf32>
    %8 = tpu.matmul %5, %6, %cst_6 {dimension_numbers = #tpu.dot_dimension_numbers<[1], [0], [0], [1], [0, 0, 1, 1], [], []>} : vector<8x8xf32>, vector<8x64xf32>, vector<8x64xf32> -> vector<8x64xf32>
    %cst_7 = arith.constant 9.99999993E-9 : f32
    %9 = vector.broadcast %cst_7 : f32 to vector<8x64xf32>
    %10 = arith.addf %8, %9 : vector<8x64xf32>
    %c0_8 = arith.constant 0 : index
    %c0_9 = arith.constant 0 : index
    %11 = vector.load %arg4[%c0_8, %c0_9] : memref<2x64xf32, #tpu.memory_space<vmem>>, vector<1x64xf32>
    %c1 = arith.constant 1 : index
    %c0_10 = arith.constant 0 : index
    %12 = vector.load %arg4[%c1, %c0_10] : memref<2x64xf32, #tpu.memory_space<vmem>>, vector<1x32xf32>
    %13 = arith.subf %3, %7 : vector<8x64xf32>
    %14 = vector.broadcast %11 : vector<1x64xf32> to vector<8x64xf32>
    %15 = arith.mulf %14, %13 : vector<8x64xf32>
    %16 = tpu.reciprocal %10 : vector<8x64xf32> -> vector<8x64xf32>
    %17 = arith.mulf %15, %16 : vector<8x64xf32>
    %18 = vector.extract_strided_slice %17 {offsets = [0, 0], sizes = [8, 32], strides = [1, 1]} : vector<8x64xf32> to vector<8x32xf32>
    %19 = vector.extract_strided_slice %17 {offsets = [0, 32], sizes = [8, 32], strides = [1, 1]} : vector<8x64xf32> to vector<8x32xf32>
    %20 = arith.addf %18, %19 : vector<8x32xf32>
    %21 = vector.broadcast %12 : vector<1x32xf32> to vector<8x32xf32>
    %22 = arith.addf %20, %21 : vector<8x32xf32>
    %c0_11 = arith.constant 0 : index
    %c0_12 = arith.constant 0 : index
    %23 = vector.load %arg5[%c0_11, %c0_12] : memref<8x32xf32, #tpu.memory_space<vmem>>, vector<8x32xf32>
    tpu.vector_store %arg5[%c0_11, %c0_12], %22 {strides = array<i32>} : memref<8x32xf32, #tpu.memory_space<vmem>>, vector<8x32xf32>,
    return
  }
  func.func @transform_0(%arg0: i32) -> (i32, i32) {
    %c0_i32 = arith.constant 0 : i32
    %c0_i32_0 = arith.constant 0 : i32
    return %arg0, %c0_i32 : i32, i32
  }
  func.func @transform_1(%arg0: i32) -> (i32, i32) {
    %c0_i32 = arith.constant 0 : i32
    %c0_i32_0 = arith.constant 0 : i32
    %c0_i32_1 = arith.constant 0 : i32
    return %c0_i32, %c0_i32_0 : i32, i32
  }
  func.func @transform_2(%arg0: i32) -> (i32, i32) {
    %c0_i32 = arith.constant 0 : i32
    %c0_i32_0 = arith.constant 0 : i32
    %c0_i32_1 = arith.constant 0 : i32
    return %c0_i32, %c0_i32_0 : i32, i32
  }
  func.func @transform_3(%arg0: i32) -> (i32, i32) {
    %c0_i32 = arith.constant 0 : i32
    %c0_i32_0 = arith.constant 0 : i32
    %c0_i32_1 = arith.constant 0 : i32
    return %c0_i32, %c0_i32_0 : i32, i32
  }
  func.func @transform_4(%arg0: i32) -> (i32, i32) {
    %c0_i32 = arith.constant 0 : i32
    %c0_i32_0 = arith.constant 0 : i32
    return %arg0, %c0_i32 : i32, i32
  }
}

</mosaic_0001>

<bundles_post_ra>
// kernel: tpu_custom_call.1
= control target key start
LH: loop header
LB: loop body
LE: loop exit
PB: predicated region body
PF: predicated region fallthrough
CT: control target
= control target key end

     0   :  { %9 = vsyncpa [#allocation3], 0  ;;  %s359_s0 = inlined_call_operand.hbm [shape: f32[8,32], index: 0, kind: input, shape index: {}]   ;;  %s360_s1 = inlined_call_operand.hbm [shape: f32[32,80], index: 1, kind: input, shape index: {}]   ;;  %s361_s2 = inlined_call_operand.hbm [shape: f32[8,64], index: 2, kind: input, shape index: {}]   ;;  %s362_s3 = inlined_call_operand.vmem [shape: f32[2,64], index: 3, kind: input, shape index: {}]   ;;  %s363_s4 = inlined_call_operand.hbm [shape: f32[8,32], index: 4, kind: output, shape index: {}]  }
   0x1   :  { %10 = vsyncpa [#allocation6], 0  ;;  %s27_s17 = sshll.u32 %s360_s1, 4  ;;  %s28_s17 = int_to_ptr.hbm [resolvable:$true] %s27_s17 }
   0x2   :  { %11 = vsyncpa [#allocation4], 0  ;;  %s305_s18 = smov [#allocation5]   ;;  %s17_s22 = sshll.u32 %s359_s0, 4  ;;  %s18_s22 = int_to_ptr.hbm [resolvable:$true] %s17_s22 }
   0x3   :  { %s29_s19 = sshll.u32 %s305_s18, 4  ;;  %s306_s23 = smov 128   ;;  %s30_s19 = int_to_ptr.vmem [resolvable:$true] %s29_s19 }
   0x4   :  { %s307_s24 = smov 8   ;;  %s308_s25 = smov [#allocation2]  }
   0x5   :  { %35 = dma.hbm_to_vmem [thread:$0]  %s28_s17, 512, %s30_s19, [#allocation6], %s306_s23, %s306_s23, %s307_s24  }
   0x6   :  { %s19_s26 = sshll.u32 %s308_s25, 4  ;;  %s41_s29 = sshll.u32 %s361_s2, 4  ;;  %s20_s26 = int_to_ptr.vmem [resolvable:$true] %s19_s26  ;;  %s42_s29 = int_to_ptr.hbm [resolvable:$true] %s41_s29 }
   0x7   :  { %22 = dma.hbm_to_vmem [thread:$0]  %s18_s22, 128, %s20_s26, [#allocation3]  }
   0x8   :  { %s309_s1 = smov [#allocation7]  }
   0x9   :  { %s43_s30 = sshll.u32 %s309_s1, 4  ;;  %s44_s30 = int_to_ptr.vmem [resolvable:$true] %s43_s30 }
   0xa   :  { %46 = dma.hbm_to_vmem [thread:$0]  %s42_s29, 128, %s44_s30, [#allocation6]  }
   0xb   :  { %299 = dma.done.wait [#allocation3], 128  }
   0xc   :  { %300 = vsyncadd [#allocation3], 4294967168 }
   0xd   :  { %301 = dma.done.wait [#allocation6], 640  }
   0xe   :  { %302 = vsyncadd [#allocation6], 4294966656  ;;  %v65_v0 = vld [vmem:[#allocation5 + $0x18] sm:$0xff]  ;;  %v64_v1 = vld [vmem:[#allocation5 + $0x10] sm:$0xff]  ;;  %vm66_vm0 = vcmask 261120   ;;  %s310_s0 = smov 56  }
   0xf   :  { %82 = vmatpush.msra.mxu0 %v65_v0  ;;  %v63_v2 = vld [vmem:[#allocation5 + $0x8] sm:$0xff]  ;;  %v62_v3 = vld [vmem:[#allocation5] sm:$0xff]  ;;  %v61_v4 = vld [vmem:[#allocation2] sm:$0xff]  ;;  %s311_s2 = smov 64   ;;  %vm94_vm1 = vcmask 64512   ;;  %s312_s7 = smov 96  }
  0x10   :  { %v90_v5 = vld [vmem:[#allocation7] sm:$0xff]  ;;  %v199_v17 = vld [vmem:[%s362_s3] ss:$0 sm:$0xff]  ;;  %v200_v26 = vld [vmem:[%s362_s3 + $0x1] ss:$0 sm:$0xff]  ;;  %s313_s10 = smov [#allocation8]  }
  0x11   :  { %83 = vmatpush.msra.mxu0 %v64_v1  ;;  %136 = vmatpush.msra.mxu2 %v90_v5  ;;  %s174_s11 = sshll.u32 %s313_s10, 4  ;;  %s176_s14 = sshll.u32 %s363_s4, 4  ;;  %s175_s11 = int_to_ptr.vmem [resolvable:$true] %s174_s11  ;;  %s177_s14 = int_to_ptr.hbm [resolvable:$true] %s176_s14 }
  0x12   :  { %112 = vmatpush.msra.mxu1 %v90_v5 }
  0x13   :  { %84 = vmatpush.msra.mxu0 %v63_v2 }
  0x15   :  { %85 = vmatpush.msra.mxu0 %v62_v3 }
  0x16   :  { %187 = vmatmul.msk.f32.vlgmr.msra.gmra.mxu0 %vm66_vm0, %v61_v4 }
  0x93   :  { %v87_v6 = vpop.f32.mrf.mxu0 }
  0x94   :  { %117 = vrot.lane.b32.xlu0 %v87_v6, %s310_s0 }
  0x9c   :  { %92 = vrot.lane.b32.xlu0 %v87_v6, %s311_s2 }
 0x106   :  { %v118_v7 = vpop.permute.xlu0 %117 }
 0x107   :  { %189 = vmatmul.msk.f32.vlgmr.msra.gmra.mxu2 %vm94_vm1, %v118_v7 }
 0x10e   :  { %v93_v8 = vpop.permute.xlu0 %92 }
 0x10f   :  { %188 = vmatmul.msk.f32.vlgmr.msra.gmra.mxu1 %vm94_vm1, %v93_v8 }
 0x18a   :  { %v138_v9 = vpop.f32.mrf.mxu2 }
 0x18b   :  { %v139_v10 = vadd.f32 1e-08, %v138_v9 }
 0x18c   :  { %v114_v13 = vpop.f32.mrf.mxu1 }
 0x18d   :  { %201 = vrcp.f32 %v139_v10  ;;  %v157_v15 = vand.u32 2147483648, %v139_v10  ;;  %v143_v16 = vsub.f32 %v87_v6, %v114_v13  ;;  %v155_v19 = vand.u32 2147483647, %v139_v10 }
 0x18e   :  { %vm151_vm3 = vweird.f32 %v139_v10 }
 0x18f   :  { %v158_v21 = vor.u32 1.1754944e-38, %v157_v15  ;;  %v145_v22 = vmul.f32 %v199_v17, %v143_v16  ;;  %vm156_vm5 = vcmp.eq.f32.partialorder %v155_v19, 8.507059e+37 }
 0x193   :  { %v202_v11 = vpop.eup %201 }
 0x194   :  { %v147_v12 = vmul.f32 %v202_v11, %v139_v10  ;;  %vm152_vm2 = vweird.f32 %v202_v11 }
 0x195   :  { %vm153_vm4 = vmor %vm151_vm3, %vm152_vm2 }
 0x196   :  { %v148_v14 = vsub.f32 1.0, %v147_v12 }
 0x198   :  { %v149_v18 = vmul.f32 %v202_v11, %v148_v14 }
 0x19a   :  { %v150_v20 = vadd.f32 %v202_v11, %v149_v18 }
 0x19c   :  { %v154_v23 = vsel %vm153_vm4, %v202_v11, %v150_v20 }
 0x19d   :  { %v159_v24 = vsel %vm156_vm5, %v158_v21, %v154_v23 }
 0x19e   :  { %v160_v25 = vmul.f32 %v159_v24, %v145_v22 }
 0x1a0   :  { %162 = vrot.lane.b32.xlu1 %v160_v25, %s312_s7 }
 0x212   :  { %v163_v27 = vpop.permute.xlu1 %162 }
 0x213   :  { %v165_v28 = vadd.f32 %v163_v27, %v160_v25 }
 0x215   :  { %v167_v29 = vadd.f32 %v200_v26, %v165_v28 }
 0x217   :  { %168 = vst.msk [vmem:[#allocation8] sm:$0xff] %vm66_vm0, %v167_v29 }
 0x218   :  { %179 = dma.vmem_to_hbm [thread:$0]  %s175_s11, 128, %s177_s14, [#allocation4]  }
 0x219   :  { %303 = dma.done.wait [#allocation4], 128  }
 0x21a   :  { %304 = vsyncadd [#allocation4], 4294967168 }
 0x21b   :  { %184 = vsyncpa [#allocation3], 1 }
 0x21c   :  { %185 = vsyncpa [#allocation6], 1 }
 0x21d   :  { %186 = vsyncpa [#allocation4], 1 }

</bundles_post_ra>
